<compile_context>
chip_gen: v6e
topology: v6e:2x2x1
jax: 0.10.0
libtpu: 0.0.40
codegen_flags: <defaults>
</compile_context>

<pallas_src>
import jax
import jax.numpy as jnp
from jax.experimental import pallas as pl
from jax.experimental.pallas import tpu as pltpu

_LANES = 128
_SUBLANES = 8
_NCORES = 2  # megacore split on v7x; just a serial outer loop on v5e/v6e


def _f1_partial_kernel(tp_ref, fp_ref, fn_ref, out_ref, acc_tp, acc_fp, acc_fn):
    """Accumulate per-lane partial sums of tp/fp/fn over the row-tile ("arbitrary") axis."""
    j = pl.program_id(1)

    @pl.when(j == 0)
    def _():
        acc_tp[...] = jnp.zeros_like(acc_tp)
        acc_fp[...] = jnp.zeros_like(acc_fp)
        acc_fn[...] = jnp.zeros_like(acc_fn)

    # Cast inside the kernel (VPU filler under the DMA bound); sublane-reduce each
    # (tile_rows, 128) tile to (1, 128) on the XLU.
    acc_tp[...] += jnp.sum(tp_ref[...].astype(jnp.float32), axis=0, keepdims=True)
    acc_fp[...] += jnp.sum(fp_ref[...].astype(jnp.float32), axis=0, keepdims=True)
    acc_fn[...] += jnp.sum(fn_ref[...].astype(jnp.float32), axis=0, keepdims=True)

    @pl.when(j == pl.num_programs(1) - 1)
    def _():
        out_ref[0:1, :] = acc_tp[...]
        out_ref[1:2, :] = acc_fp[...]
        out_ref[2:3, :] = acc_fn[...]


def f1_score_micro(tp, fp, fn, tn=None, *, tile_rows=1024):
    """Pallas TPU implementation of smp.metrics.f1_score(tp, fp, fn, tn, reduction='micro')."""
    del tn  # not used by the micro-F1 formula -> never DMA'd into VMEM

    n = int(tp.size)
    rows = -(-n // _LANES)                                     # rows of the lane-dense (rows, 128) layout
    tr = min(int(tile_rows), -(-rows // _SUBLANES) * _SUBLANES)
    tr = max(_SUBLANES, (tr // _SUBLANES) * _SUBLANES)         # tile rows: multiple of 8 sublanes
    rows_padded = -(-rows // (_NCORES * tr)) * (_NCORES * tr)
    total = rows_padded * _LANES
    tiles_per_core = rows_padded // (_NCORES * tr)

    def _prep(x):
        x = jnp.ravel(x)
        x = jnp.pad(x, (0, total - n))                         # zero padding does not change the sums
        return x.reshape(rows_padded, _LANES)

    tp2d, fp2d, fn2d = _prep(tp), _prep(fp), _prep(fn)

    def in_index_map(i, j):
        return (i * tiles_per_core + j, 0)

    in_spec = pl.BlockSpec((tr, _LANES), in_index_map)

    parts = pl.pallas_call(
        _f1_partial_kernel,
        out_shape=jax.ShapeDtypeStruct((_NCORES, 3, _LANES), jnp.float32),
        grid=(_NCORES, tiles_per_core),
        in_specs=[in_spec, in_spec, in_spec],
        out_specs=pl.BlockSpec((None, 3, _LANES), lambda i, j: (i, 0, 0)),
        scratch_shapes=[pltpu.VMEM((1, _LANES), jnp.float32) for _ in range(3)],
        compiler_params=pltpu.CompilerParams(
            dimension_semantics=("parallel", "arbitrary")),
    )(tp2d, fp2d, fn2d)

    # Tiny epilogue: combine the per-core per-lane partial sums and apply the F1 formula.
    sums = jnp.sum(parts, axis=(0, 2))                         # (3,) = [tp_s, fp_s, fn_s]
    tp_s, fp_s, fn_s = sums[0], sums[1], sums[2]
    num = 2.0 * tp_s
    den = num + fn_s + fp_s
    # zero_division=1.0 (smp default): 0/0 -> 1.0
    return jnp.where(den == 0.0, jnp.float32(1.0), num / den)


def _reference(tp, fp, fn):
    tp_s = jnp.sum(tp).astype(jnp.float32)
    fp_s = jnp.sum(fp).astype(jnp.float32)
    fn_s = jnp.sum(fn).astype(jnp.float32)
    denom = 2.0 * tp_s + fn_s + fp_s
    return jnp.where(denom == 0.0, 1.0, 2.0 * tp_s / denom)


if __name__ == "__main__":
    key = jax.random.PRNGKey(0)
    k_tp, k_fp, k_fn, k_tn = jax.random.split(key, 4)

    # Case 1: typical (batch, num_classes) confusion-matrix stats as produced by smp get_stats.
    batch, num_classes = 2, 4
    tp = jax.random.randint(k_tp, (batch, num_classes), 0, 100, dtype=jnp.int32)
    fp = jax.random.randint(k_fp, (batch, num_classes), 0, 50, dtype=jnp.int32)
    fn = jax.random.randint(k_fn, (batch, num_classes), 0, 50, dtype=jnp.int32)
    tn = jax.random.randint(k_tn, (batch, num_classes), 0, 200, dtype=jnp.int32)

    score = f1_score_micro(tp, fp, fn, tn)
    score = jax.block_until_ready(score)
    ref = _reference(tp, fp, fn)
    assert jnp.allclose(score, ref, rtol=1e-6, atol=1e-6), (score, ref)

    # Case 2: larger stats tensor with a small tile to exercise padding + multi-tile accumulation.
    tp2 = jax.random.randint(k_tp, (512, 16), 0, 1000, dtype=jnp.int32)
    fp2 = jax.random.randint(k_fp, (512, 16), 0, 500, dtype=jnp.int32)
    fn2 = jax.random.randint(k_fn, (512, 16), 0, 500, dtype=jnp.int32)
    tn2 = jnp.zeros((512, 16), jnp.int32)

    score2 = f1_score_micro(tp2, fp2, fn2, tn2, tile_rows=8)
    score2 = jax.block_until_ready(score2)
    ref2 = _reference(tp2, fp2, fn2)
    assert jnp.allclose(score2, ref2, rtol=1e-6, atol=1e-6), (score2, ref2)

    # Case 3: all-zero stats -> zero_division=1.0 path.
    z = jnp.zeros((4, 4), jnp.int32)
    score3 = jax.block_until_ready(f1_score_micro(z, z, z, z))
    assert jnp.allclose(score3, 1.0), score3

    print("KERNEL_OK")
</pallas_src>

<mosaic_0001>
module attributes {stable_mosaic.version = 11 : i64} {
  func.func @_f1_partial_kernel(%arg0: i32, %arg1: i32, %arg2: memref<8x128xi32, #tpu.memory_space<vmem>>, %arg3: memref<8x128xi32, #tpu.memory_space<vmem>>, %arg4: memref<8x128xi32, #tpu.memory_space<vmem>>, %arg5: memref<1x3x128xf32, #tpu.memory_space<vmem>>, %arg6: memref<1x128xf32, #tpu.memory_space<vmem>>, %arg7: memref<1x128xf32, #tpu.memory_space<vmem>>, %arg8: memref<1x128xf32, #tpu.memory_space<vmem>>) attributes {dimension_semantics = [#tpu.dimension_semantics<parallel>, #tpu.dimension_semantics<arbitrary>], iteration_bounds = array<i64: 2, 1>, scalar_prefetch = 0 : i64, scratch_operands = 3 : i64, tpu.core_type = #tpu.core_type<tc>, window_params = [{transform_indices = @transform_0, window_bounds = array<i64: 8, 128>}, {transform_indices = @transform_1, window_bounds = array<i64: 8, 128>}, {transform_indices = @transform_2, window_bounds = array<i64: 8, 128>}, {transform_indices = @transform_3, window_bounds = array<i64: 1, 3, 128>}]} {
    %c0_i32 = arith.constant 0 : i32
    %0 = arith.cmpi eq, %arg1, %c0_i32 : i32
    %1 = arith.extui %0 : i1 to i32
    %c0_i32_0 = arith.constant 0 : i32
    %2 = arith.cmpi ne, %1, %c0_i32_0 : i32
    scf.if %2 {
      %cst_22 = arith.constant 0.000000e+00 : f32
      %27 = vector.broadcast %cst_22 : f32 to vector<1x128xf32>
      %c0_23 = arith.constant 0 : index
      %c0_24 = arith.constant 0 : index
      %28 = vector.load %arg6[%c0_23, %c0_24] : memref<1x128xf32, #tpu.memory_space<vmem>>, vector<1x128xf32>
      tpu.vector_store %arg6[%c0_23, %c0_24], %27 {strides = array<i32>} : memref<1x128xf32, #tpu.memory_space<vmem>>, vector<1x128xf32>,
      %cst_25 = arith.constant 0.000000e+00 : f32
      %29 = vector.broadcast %cst_25 : f32 to vector<1x128xf32>
      %c0_26 = arith.constant 0 : index
      %c0_27 = arith.constant 0 : index
      %30 = vector.load %arg7[%c0_26, %c0_27] : memref<1x128xf32, #tpu.memory_space<vmem>>, vector<1x128xf32>
      tpu.vector_store %arg7[%c0_26, %c0_27], %29 {strides = array<i32>} : memref<1x128xf32, #tpu.memory_space<vmem>>, vector<1x128xf32>,
      %cst_28 = arith.constant 0.000000e+00 : f32
      %31 = vector.broadcast %cst_28 : f32 to vector<1x128xf32>
      %c0_29 = arith.constant 0 : index
      %c0_30 = arith.constant 0 : index
      %32 = vector.load %arg8[%c0_29, %c0_30] : memref<1x128xf32, #tpu.memory_space<vmem>>, vector<1x128xf32>
      tpu.vector_store %arg8[%c0_29, %c0_30], %31 {strides = array<i32>} : memref<1x128xf32, #tpu.memory_space<vmem>>, vector<1x128xf32>,
    } else {
    }
    %c0 = arith.constant 0 : index
    %c0_1 = arith.constant 0 : index
    %3 = vector.load %arg6[%c0, %c0_1] : memref<1x128xf32, #tpu.memory_space<vmem>>, vector<1x128xf32>
    %c0_2 = arith.constant 0 : index
    %c0_3 = arith.constant 0 : index
    %4 = vector.load %arg2[%c0_2, %c0_3] : memref<8x128xi32, #tpu.memory_space<vmem>>, vector<8x128xi32>
    %5 = arith.sitofp %4 : vector<8x128xi32> to vector<8x128xf32>
    %cst = arith.constant dense<0.000000e+00> : vector<128xf32>
    %6 = vector.multi_reduction <add>, %5, %cst [0] : vector<8x128xf32> to vector<128xf32>
    %7 = vector.shape_cast %6 : vector<128xf32> to vector<1x128xf32>
    %8 = arith.addf %3, %7 : vector<1x128xf32>
    %c0_4 = arith.constant 0 : index
    %c0_5 = arith.constant 0 : index
    %9 = vector.load %arg6[%c0_4, %c0_5] : memref<1x128xf32, #tpu.memory_space<vmem>>, vector<1x128xf32>
    tpu.vector_store %arg6[%c0_4, %c0_5], %8 {strides = array<i32>} : memref<1x128xf32, #tpu.memory_space<vmem>>, vector<1x128xf32>,
    %c0_6 = arith.constant 0 : index
    %c0_7 = arith.constant 0 : index
    %10 = vector.load %arg7[%c0_6, %c0_7] : memref<1x128xf32, #tpu.memory_space<vmem>>, vector<1x128xf32>
    %c0_8 = arith.constant 0 : index
    %c0_9 = arith.constant 0 : index
    %11 = vector.load %arg3[%c0_8, %c0_9] : memref<8x128xi32, #tpu.memory_space<vmem>>, vector<8x128xi32>
    %12 = arith.sitofp %11 : vector<8x128xi32> to vector<8x128xf32>
    %cst_10 = arith.constant dense<0.000000e+00> : vector<128xf32>
    %13 = vector.multi_reduction <add>, %12, %cst_10 [0] : vector<8x128xf32> to vector<128xf32>
    %14 = vector.shape_cast %13 : vector<128xf32> to vector<1x128xf32>
    %15 = arith.addf %10, %14 : vector<1x128xf32>
    %c0_11 = arith.constant 0 : index
    %c0_12 = arith.constant 0 : index
    %16 = vector.load %arg7[%c0_11, %c0_12] : memref<1x128xf32, #tpu.memory_space<vmem>>, vector<1x128xf32>
    tpu.vector_store %arg7[%c0_11, %c0_12], %15 {strides = array<i32>} : memref<1x128xf32, #tpu.memory_space<vmem>>, vector<1x128xf32>,
    %c0_13 = arith.constant 0 : index
    %c0_14 = arith.constant 0 : index
    %17 = vector.load %arg8[%c0_13, %c0_14] : memref<1x128xf32, #tpu.memory_space<vmem>>, vector<1x128xf32>
    %c0_15 = arith.constant 0 : index
    %c0_16 = arith.constant 0 : index
    %18 = vector.load %arg4[%c0_15, %c0_16] : memref<8x128xi32, #tpu.memory_space<vmem>>, vector<8x128xi32>
    %19 = arith.sitofp %18 : vector<8x128xi32> to vector<8x128xf32>
    %cst_17 = arith.constant dense<0.000000e+00> : vector<128xf32>
    %20 = vector.multi_reduction <add>, %19, %cst_17 [0] : vector<8x128xf32> to vector<128xf32>
    %21 = vector.shape_cast %20 : vector<128xf32> to vector<1x128xf32>
    %22 = arith.addf %17, %21 : vector<1x128xf32>
    %c0_18 = arith.constant 0 : index
    %c0_19 = arith.constant 0 : index
    %23 = vector.load %arg8[%c0_18, %c0_19] : memref<1x128xf32, #tpu.memory_space<vmem>>, vector<1x128xf32>
    tpu.vector_store %arg8[%c0_18, %c0_19], %22 {strides = array<i32>} : memref<1x128xf32, #tpu.memory_space<vmem>>, vector<1x128xf32>,
    %c0_i32_20 = arith.constant 0 : i32
    %24 = arith.cmpi eq, %arg1, %c0_i32_20 : i32
    %25 = arith.extui %24 : i1 to i32
    %c0_i32_21 = arith.constant 0 : i32
    %26 = arith.cmpi ne, %25, %c0_i32_21 : i32
    scf.if %26 {
      %c0_22 = arith.constant 0 : index
      %c0_23 = arith.constant 0 : index
      %27 = vector.load %arg6[%c0_22, %c0_23] : memref<1x128xf32, #tpu.memory_space<vmem>>, vector<1x128xf32>
      %c0_24 = arith.constant 0 : index
      %c0_25 = arith.constant 0 : index
      %c0_26 = arith.constant 0 : index
      %28 = vector.load %arg5[%c0_24, %c0_25, %c0_26] : memref<1x3x128xf32, #tpu.memory_space<vmem>>, vector<1x1x128xf32>
      %29 = vector.shape_cast %28 : vector<1x1x128xf32> to vector<1x128xf32>
      %30 = vector.shape_cast %27 : vector<1x128xf32> to vector<1x1x128xf32>
      tpu.vector_store %arg5[%c0_24, %c0_25, %c0_26], %30 {strides = array<i32>} : memref<1x3x128xf32, #tpu.memory_space<vmem>>, vector<1x1x128xf32>,
      %c0_27 = arith.constant 0 : index
      %c0_28 = arith.constant 0 : index
      %31 = vector.load %arg7[%c0_27, %c0_28] : memref<1x128xf32, #tpu.memory_space<vmem>>, vector<1x128xf32>
      %c0_29 = arith.constant 0 : index
      %c1 = arith.constant 1 : index
      %c0_30 = arith.constant 0 : index
      %32 = vector.load %arg5[%c0_29, %c1, %c0_30] : memref<1x3x128xf32, #tpu.memory_space<vmem>>, vector<1x1x128xf32>
      %33 = vector.shape_cast %32 : vector<1x1x128xf32> to vector<1x128xf32>
      %34 = vector.shape_cast %31 : vector<1x128xf32> to vector<1x1x128xf32>
      tpu.vector_store %arg5[%c0_29, %c1, %c0_30], %34 {strides = array<i32>} : memref<1x3x128xf32, #tpu.memory_space<vmem>>, vector<1x1x128xf32>,
      %c0_31 = arith.constant 0 : index
      %c0_32 = arith.constant 0 : index
      %35 = vector.load %arg8[%c0_31, %c0_32] : memref<1x128xf32, #tpu.memory_space<vmem>>, vector<1x128xf32>
      %c0_33 = arith.constant 0 : index
      %c2 = arith.constant 2 : index
      %c0_34 = arith.constant 0 : index
      %36 = vector.load %arg5[%c0_33, %c2, %c0_34] : memref<1x3x128xf32, #tpu.memory_space<vmem>>, vector<1x1x128xf32>
      %37 = vector.shape_cast %36 : vector<1x1x128xf32> to vector<1x128xf32>
      %38 = vector.shape_cast %35 : vector<1x128xf32> to vector<1x1x128xf32>
      tpu.vector_store %arg5[%c0_33, %c2, %c0_34], %38 {strides = array<i32>} : memref<1x3x128xf32, #tpu.memory_space<vmem>>, vector<1x1x128xf32>,
    } else {
    }
    return
  }
  func.func @transform_0(%arg0: i32, %arg1: i32) -> (i32, i32) {
    %c1_i32 = arith.constant 1 : i32
    %0 = arith.muli %arg0, %c1_i32 : i32
    %1 = arith.addi %0, %arg1 : i32
    %c0_i32 = arith.constant 0 : i32
    %c0_i32_0 = arith.constant 0 : i32
    return %1, %c0_i32 : i32, i32
  }
  func.func @transform_1(%arg0: i32, %arg1: i32) -> (i32, i32) {
    %c1_i32 = arith.constant 1 : i32
    %0 = arith.muli %arg0, %c1_i32 : i32
    %1 = arith.addi %0, %arg1 : i32
    %c0_i32 = arith.constant 0 : i32
    %c0_i32_0 = arith.constant 0 : i32
    return %1, %c0_i32 : i32, i32
  }
  func.func @transform_2(%arg0: i32, %arg1: i32) -> (i32, i32) {
    %c1_i32 = arith.constant 1 : i32
    %0 = arith.muli %arg0, %c1_i32 : i32
    %1 = arith.addi %0, %arg1 : i32
    %c0_i32 = arith.constant 0 : i32
    %c0_i32_0 = arith.constant 0 : i32
    return %1, %c0_i32 : i32, i32
  }
  func.func @transform_3(%arg0: i32, %arg1: i32) -> (i32, i32, i32) {
    %c0_i32 = arith.constant 0 : i32
    %c0_i32_0 = arith.constant 0 : i32
    %c0_i32_1 = arith.constant 0 : i32
    return %arg0, %c0_i32, %c0_i32_0 : i32, i32, i32
  }
}

</mosaic_0001>

<bundles_post_ra>
// kernel: tpu_custom_call.1
= control target key start
LH: loop header
LB: loop body
LE: loop exit
PB: predicated region body
PF: predicated region fallthrough
CT: control target
= control target key end

     0   :  { %8 = vsyncpa [#allocation6], 0  ;;  %s840_s0 = inlined_call_operand.hbm [shape: s32[16,128], index: 0, kind: input, shape index: {}]   ;;  %s841_s1 = inlined_call_operand.hbm [shape: s32[16,128], index: 1, kind: input, shape index: {}]   ;;  %s842_s2 = inlined_call_operand.hbm [shape: s32[16,128], index: 2, kind: input, shape index: {}]   ;;  %s843_s3 = inlined_call_operand.vmem [shape: f32[2,3,128], index: 3, kind: output, shape index: {}]  }
   0x1   :  { %10 = vsyncpa [#allocation6 + $0x1], 0 }
   0x2   :  { %11 = vsyncpa [#allocation8], 0 }
   0x3   :  { %13 = vsyncpa [#allocation8 + $0x1], 0  ;;  %s696_s12 = smov 0   ;;  %s698_s13 = smov 0  }
   0x4   :  { %s700_s14 = smov 0   ;;  %s702_s15 = smov 0  }
   0x5   :  { %s704_s16 = smov 0   ;;  %s706_s17 = smov 0  }
   0x6 LB: > { %s449_s18 = sadd.s32 4294967295, %s670_s17   ;;  %s31_s19 = sadd.s32 1, %s666_s16  ;;  %s670_s17 = sphi %s706_s17, %s19_s17   ;;  %s666_s16 = sphi %s704_s16, %s851_s16   ;;  %s662_s15 = sphi %s702_s15, %s850_s15   ;;  %s658_s14 = sphi %s700_s14, %s849_s14   ;;  %s654_s13 = sphi %s698_s13, %s848_s13   ;;  %s650_s12 = sphi %s696_s12, %s847_s12  }
   0x7   : > { %p33_p0 = scmp.ge.s32.totalorder %s31_s19, 2  ;;  %s40_s20 = sadd.s32 1, %s658_s14 }
   0x8   : > { %p47_p1 = scmp.ne.s32.totalorder %s658_s14, %s654_s13  ;;  %p48_p2 = scmp.eq.s32.totalorder %s670_s17, 0 }
   0x9   : > { %s853_s19 = smov (%p33_p0, %s31_s19), 0  ;;  %p53_p4 = scmp.ne.s32.totalorder %s654_s13, %s650_s12 }
   0xa   : > { %p49_p3 = por %p48_p2, %p47_p1  ;;  %s37_s21 = ssub.s32 %s666_s16, %s853_s19 }
   0xb   : > { %p54_p5 = scmp.eq.s32.totalorder %s449_s18, 0  ;;  %p38_p6 = scmp.eq.s32.totalorder %s37_s21, 0 }
   0xc   : > { %p482_p8 = scmp.lt.s32.totalorder %s670_s17, 2  ;;  %s159_s24 = sand.u32 1, %s658_s14  }
   0xd   : > { %p737_p7 = por %p54_p5, %p53_p4  ;;  %s747_s25 = sshll.u32 %s666_s16, 7 }
   0xe   : > { %s743_s23 = scalar_select %p38_p6, %s658_s14, %s40_s20  }
   0xf   : > { %s751_s26 = sshll.u32 %s159_s24, 3  ;;  %p753_p9 = pnand %p482_p8, %p49_p3 }
  0x10   : > { %s178_s28 = sand.u32 1, %s670_s17   ;;  %s188_s4 = scalar_lea.hbm %s841_s1, %s747_s25 }
  0x11   : > { %s182_s5 = scalar_lea.vmem [#allocation7], %s751_s26  ;;  %p459_p10 = scmp.ge.s32.totalorder %s670_s17, 1 }
  0x12   : > { %s190_s6 = sshll.u32 %s182_s5, 4  ;;  %s764_s7 = scalar_lea.sflag [#allocation8], %s178_s28  ;;  %s191_s6 = int_to_ptr.vmem [resolvable:$true] %s190_s6 }
  0x13   : > { %p534_p11 = pneg %p753_p9  ;;  %s545_s8 = scalar_lea.vmem %s191_s6, 128 }
  0x14   : > { %p546_p12 = scmp.ne.s32.totalorder %s191_s6, %s545_s8  ;;  %s672_s9 = smov [#allocation7]  }
  0x15   : > { %s550_s10 = sshll.u32 %s672_s9, 4  ;;  %s551_s10 = int_to_ptr.vmem [resolvable:$false] %s550_s10 }
  0x16   : > { %p548_p13 = pnand %p546_p12, %p534_p11  ;;  %s552_s11 = scalar_lea.vmem %s551_s10, 256 }
  0x17   : > { %p553_p1 = scmp.lt.s32.totalorder %s191_s6, %s551_s10  ;;  %p554_p2 = scmp.lt.s32.totalorder %s552_s11, %s545_s8 }
  0x18   : > { %p549_p0 = pneg %p548_p13 }
  0x19   : > { %p555_p3 = por %p554_p2, %p553_p1 }
  0x1b   : > { %p556_p4 = pnand %p555_p3, %p549_p0 }
  0x1d   : > { %559 = shalt.err (!%p556_p4)
}
  0x1e   : > { %478 = dma.hbm_to_vmem [thread:$0]  (!%p753_p9), %s188_s4, 128, %s191_s6, %s764_s7  }
  0x1f   : > { %p214_p5 = scmp.lt.s32.totalorder %s670_s17, 3  ;;  %s169_s28 = scalar_lea.hbm %s840_s0, %s747_s25 }
  0x20   : > { %s163_s29 = scalar_lea.vmem [#allocation5], %s751_s26  ;;  %s160_s5 = scalar_lea.sflag [#allocation6], %s159_s24 }
  0x21   : > { %p777_p6 = pnand %p459_p10, %p214_p5  ;;  %s171_s30 = sshll.u32 %s163_s29, 4  ;;  %s172_s30 = int_to_ptr.vmem [resolvable:$true] %s171_s30 }
  0x22   : > { %s573_s8 = scalar_lea.vmem %s172_s30, 128  ;;  %s673_s4 = smov [#allocation5]  }
  0x23   : > { %p574_p8 = scmp.ne.s32.totalorder %s172_s30, %s573_s8  ;;  %s578_s6 = sshll.u32 %s673_s4, 4  ;;  %s579_s6 = int_to_ptr.vmem [resolvable:$false] %s578_s6 }
  0x24   : > { %s580_s9 = scalar_lea.vmem %s579_s6, 256  ;;  %p581_p10 = scmp.lt.s32.totalorder %s172_s30, %s579_s6 }
  0x25   : > { %p576_p12 = pnand %p574_p8, %p534_p11  ;;  %p582_p0 = scmp.lt.s32.totalorder %s580_s9, %s573_s8 }
  0x27   : > { %p577_p13 = pneg %p576_p12  ;;  %p583_p1 = por %p582_p0, %p581_p10 }
  0x29   : > { %p584_p2 = pnand %p583_p1, %p577_p13 }
  0x2b   : > { %587 = shalt.err (!%p584_p2)
}
  0x2c   : > { %475 = dma.hbm_to_vmem [thread:$0]  (!%p753_p9), %s169_s28, 128, %s172_s30, %s160_s5  }
  0x2d   : > { %s207_s11 = scalar_lea.hbm %s842_s2, %s747_s25  ;;  %s201_s20 = scalar_lea.vmem [#allocation9], %s751_s26 }
  0x2e   : > { %s209_s21 = sshll.u32 %s201_s20, 4  ;;  %s674_s8 = smov [#allocation9]   ;;  %s210_s21 = int_to_ptr.vmem [resolvable:$true] %s209_s21 }
  0x2f   : > { %s601_s29 = scalar_lea.vmem %s210_s21, 128  ;;  %s606_s4 = sshll.u32 %s674_s8, 4  ;;  %s607_s4 = int_to_ptr.vmem [resolvable:$false] %s606_s4 }
  0x30   : > { %p602_p3 = scmp.ne.s32.totalorder %s210_s21, %s601_s29  ;;  %s608_s6 = scalar_lea.vmem %s607_s4, 256 }
  0x31   : > { %p609_p8 = scmp.lt.s32.totalorder %s210_s21, %s607_s4  ;;  %p610_p12 = scmp.lt.s32.totalorder %s608_s6, %s601_s29 }
  0x32   : > { %p604_p4 = pnand %p602_p3, %p534_p11 }
  0x33   : > { %p611_p13 = por %p610_p12, %p609_p8 }
  0x34   : > { %p605_p5 = pneg %p604_p4 }
  0x36   : > { %p612_p10 = pnand %p611_p13, %p605_p5 }
  0x38   : > { %615 = shalt.err (!%p612_p10)
}
  0x39   : > { %481 = dma.hbm_to_vmem [thread:$0]  (!%p753_p9), %s207_s11, 128, %s210_s21, %s764_s7  }
  0x3a   : > { %218 = sbr.rel (%p777_p6) target bundleno = 94 (0x5e), region = 32  ;;  %s220_s25 = sand.u32 (!%p777_p6), 1, %s654_s13  }
  0x3b   : > { %s460_s26 = sshll.u32 (!%p777_p6), %s220_s25, 3  ;;  %s221_s28 = scalar_lea.sflag (!%p777_p6), [#allocation6], %s220_s25 }
  0x3c   : > { %s224_s30 = scalar_lea.vmem (!%p777_p6), [#allocation5], %s460_s26 }
  0x3f   : > { %641 = dma.done.wait (%p737_p7), %s221_s28, 128  }
  0x40   : > { %643 = vsyncadd (%p737_p7), %s221_s28, 4294967168  ;;  %s229_s27 = sand.u32 1, %s449_s18   ;;  %s233_s7 = scalar_lea.vmem [#allocation7], %s460_s26 }
  0x41   : > { %s230_s5 = scalar_lea.sflag [#allocation8], %s229_s27 }
  0x42   : > { %645 = dma.done.wait (%p737_p7), %s230_s5, 256  }
  0x43   : > { %647 = vsyncadd (%p737_p7), %s230_s5, 4294967040  ;;  %v675_v0 = vmov 0.0   ;;  %v289_v1 = vld [vmem:[%s224_s30] sm:$0xff]  ;;  %v300_v2 = vld [vmem:[%s233_s7] sm:$0xff]  ;;  %s242_s12 = scalar_lea.vmem [#allocation9], %s460_s26  ;;  %p277_p7 = scmp.lt.s32.totalorder %s662_s15, 1 }
  0x44   : > { %285 = vst [vmem:[#allocation2] sm:$0x1] %v675_v0  ;;  %286 = vst [vmem:[#allocation3] sm:$0x1] %v675_v0  ;;  %v311_v3 = vld [vmem:[%s242_s12] sm:$0xff]  ;;  %v290_v4 = vcvt.s32.f32 %v289_v1  ;;  %v301_v5 = vcvt.s32.f32 %v300_v2 }
  0x45   : > { %287 = vst [vmem:[#allocation4] sm:$0x1] %v675_v0  ;;  %v312_v6 = vcvt.s32.f32 %v311_v3  ;;  %s855_s15 = smov (!%p277_p7, %s662_s15), 1 }
  0x46   : > { %v291_v7 = vrot.slane %v290_v4, 4  ;;  %v302_v8 = vrot.slane %v301_v5, 4  ;;  %s463_s18 = sshll.u32 %s855_s15, 2 }
  0x47   : > { %v313_v9 = vrot.slane %v312_v6, 4  ;;  %s280_s24 = scalar_lea.vmem %s843_s3, %s463_s18 }
  0x48   : > { %v292_v10 = vadd.f32 %v291_v7, %v290_v4  ;;  %v303_v11 = vadd.f32 %v302_v8, %v301_v5 }
  0x49   : > { %v314_v12 = vadd.f32 %v313_v9, %v312_v6 }
  0x4a   : > { %v293_v13 = vrot.slane %v292_v10, 2  ;;  %v304_v14 = vrot.slane %v303_v11, 2 }
  0x4b   : > { %v315_v15 = vrot.slane %v314_v12, 2  ;;  %v288_v22 = vld [vmem:[#allocation2] sm:$0x1]  ;;  %v299_v23 = vld [vmem:[#allocation3] sm:$0x1] }
  0x4c   : > { %v294_v16 = vadd.f32 %v293_v13, %v292_v10  ;;  %v305_v17 = vadd.f32 %v304_v14, %v303_v11  ;;  %v310_v24 = vld [vmem:[#allocation4] sm:$0x1] }
  0x4d   : > { %v316_v18 = vadd.f32 %v315_v15, %v314_v12 }
  0x4e   : > { %v295_v19 = vrot.slane %v294_v16, 1  ;;  %v306_v20 = vrot.slane %v305_v17, 1 }
  0x4f   : > { %v317_v21 = vrot.slane %v316_v18, 1 }
  0x50   : > { %v296_v25 = vadd.f32 %v295_v19, %v294_v16  ;;  %v307_v26 = vadd.f32 %v306_v20, %v305_v17 }
  0x51   : > { %v318_v27 = vadd.f32 %v317_v21, %v316_v18 }
  0x52   : > { %v297_v28 = vadd.f32 %v296_v25, %v288_v22  ;;  %v308_v29 = vadd.f32 %v307_v26, %v299_v23 }
  0x53   : > { %v319_v30 = vadd.f32 %v318_v27, %v310_v24 }
  0x54   : > { %298 = vst [vmem:[#allocation2] sm:$0x1] %v297_v28  ;;  %309 = vst [vmem:[#allocation3] sm:$0x1] %v308_v29 }
  0x55   : > { %320 = vst [vmem:[#allocation4] sm:$0x1] %v319_v30 }
  0x5b   : > { %v324_v31 = vld [vmem:[#allocation2] sm:$0x1]  ;;  %v326_v32 = vld [vmem:[#allocation3] sm:$0x1] }
  0x5c   : > { %v328_v33 = vld [vmem:[#allocation4] sm:$0x1]  ;;  %325 = vst [vmem:[%s280_s24] sm:$0x1] %v324_v31  ;;  %327 = vst [vmem:[%s280_s24 + $0x1] sm:$0x1] %v326_v32 }
  0x5d   : > { %329 = vst [vmem:[%s280_s24 + $0x2] sm:$0x1] %v328_v33 }
  0x5e PF: > { %s19_s17 = sadd.s32 1, %s670_s17   ;;  %s847_s12 = smov %s654_s13 }
  0x5f   : > { %p16_p9 = scmp.ge.s32.totalorder %s19_s17, 4   ;;  %s848_s13 = smov %s658_s14 }
  0x60   : > { %s849_s14 = smov %s743_s23  ;;  %s850_s15 = smov %s666_s16 }
  0x61   : > { %s851_s16 = smov %s853_s19  ;;  %18 = sbr.rel (!%p16_p9) target bundleno = 6 (0x6), region = 104 }
  0x66   :  { %349 = vsyncpa [#allocation6], 1 }
  0x67   :  { %351 = vsyncpa [#allocation6 + $0x1], 1 }
  0x68   :  { %352 = vsyncpa [#allocation8], 1 }
  0x69   :  { %354 = vsyncpa [#allocation8 + $0x1], 1 }

</bundles_post_ra>
